<compile_context>
chip_gen: v5e
topology: v5e:2x2
jax: 0.10.0
libtpu: 0.0.40
codegen_flags: <defaults>
</compile_context>

<pallas_src>
import functools

import jax
import jax.numpy as jnp
from jax.experimental import pallas as pl
from jax.experimental.pallas import tpu as pltpu


def _round_up(n, m):
    return ((n + m - 1) // m) * m


def _srmsnorm_kernel(x_ref, o_ref, *, eps, inv_sqrt_d):
    # Promote to fp32 (matches x.to(torch.float32) in the reference module).
    x = x_ref[...].astype(jnp.float32)
    # L2 norm along the last (lane) axis, keepdim.  The block covers the full
    # feature dim, so the sum of squares is exact (no padded-lane masking
    # needed).
    sq_sum = jnp.sum(x * x, axis=-1, keepdims=True)
    denom = inv_sqrt_d * jnp.sqrt(sq_sum) + eps      # (block_rows, 1)
    # Exact fp32 divide: one value per row, negligible on this HBM-bound op,
    # matches the PyTorch reference numerics.
    o_ref[...] = (x / denom).astype(o_ref.dtype)


def srms_norm(x, eps=1e-6, block_rows=None, target_block_bytes=4 * 1024 * 1024):
    """SRMSNorm over the last axis of x (any leading shape)."""
    orig_shape = x.shape
    d = orig_shape[-1]
    x2 = x.reshape(-1, d)
    rows = x2.shape[0]
    itemsize = jnp.dtype(x.dtype).itemsize

    # Sublane packing: 8 rows for fp32, 16 for bf16, 32 for int8/fp8.
    pack = max(8, 32 // itemsize)

    if block_rows is None:
        # ~4 MiB per input block: big enough to amortize grid-step overhead on
        # this bandwidth-bound op (v6e/v7x), small enough that double-buffered
        # in+out plus fp32 intermediates stay well inside VMEM on all parts.
        row_bytes = max(1, d * itemsize)
        block_rows = max(pack, (target_block_bytes // row_bytes) // pack * pack)
    block_rows = int(block_rows)
    block_rows = max(pack, (block_rows // pack) * pack)

    if block_rows >= rows:
        if rows > pack:
            # Keep at least 2 grid steps so the "parallel" axis can be shared
            # across both v7x TensorCores (harmless on single-TC v5e/v6e).
            half = _round_up(pl.cdiv(rows, 2), pack)
            block_rows = half if half < rows else rows
        else:
            # Tiny input: one block equal to the full row extent (full-dim
            # block shapes are exempt from the 8-row divisibility rule).
            block_rows = rows

    grid = (pl.cdiv(rows, block_rows),)

    kernel = functools.partial(
        _srmsnorm_kernel, eps=float(eps), inv_sqrt_d=float(d) ** -0.5
    )

    # Exact traffic: read x once, write y once (no wrapper padding anymore).
    cost = pl.CostEstimate(
        flops=3 * rows * d,                        # square, sum, scale
        transcendentals=2 * rows,                  # sqrt + divide per row
        bytes_accessed=2 * rows * d * itemsize,
    )

    # VMEM budget: double-buffered input + output blocks, fp32 intermediates,
    # plus a small margin.  Stays under the 64 MiB v7x VMEM for the default
    # block size while avoiding spills against v5e's 16 MiB scoped default.
    block_bytes = block_rows * d * itemsize
    fp32_block_bytes = block_rows * d * 4
    vmem_needed = 4 * block_bytes + 2 * fp32_block_bytes + (4 << 20)
    vmem_limit_bytes = int(min(max(vmem_needed, 16 << 20), 60 << 20))

    out = pl.pallas_call(
        kernel,
        out_shape=jax.ShapeDtypeStruct((rows, d), x.dtype),
        grid_spec=pltpu.PrefetchScalarGridSpec(
            num_scalar_prefetch=0,
            grid=grid,
            # Lane dim is always the full feature size d (norm needs the whole
            # row); row dim is a pack-multiple, with the ragged final block
            # masked by Pallas.
            in_specs=[pl.BlockSpec((block_rows, d), lambda i: (i, 0))],
            out_specs=pl.BlockSpec((block_rows, d), lambda i: (i, 0)),
        ),
        compiler_params=pltpu.CompilerParams(
            dimension_semantics=("parallel",),     # megacore-shardable grid
            vmem_limit_bytes=vmem_limit_bytes,
        ),
        cost_estimate=cost,
    )(x2)

    return out.reshape(orig_shape)


def srms_norm_ref(x, eps=1e-6):
    dtype = x.dtype
    xf = x.astype(jnp.float32)
    norm = jnp.sqrt(jnp.sum(xf * xf, axis=-1, keepdims=True))
    y = xf / (xf.shape[-1] ** (-0.5) * norm + eps)
    return y.astype(dtype)


if __name__ == "__main__":
    key = jax.random.PRNGKey(0)
    # (batch=2, seq=8, hidden=32)
    x = jax.random.normal(key, (2, 8, 32), dtype=jnp.float32)
    eps = 1e-6

    out = jax.block_until_ready(srms_norm(x, eps=eps))
    ref = srms_norm_ref(x, eps=eps)

    assert out.shape == x.shape and out.dtype == x.dtype
    # Exact fp32 divide in-kernel -> only reduction-order noise remains.
    assert jnp.allclose(out, ref, atol=1e-5, rtol=1e-5)

    print("KERNEL_OK")
</pallas_src>

<mosaic_0001>
module attributes {stable_mosaic.version = 11 : i64} {
  func.func @_srmsnorm_kernel(%arg0: i32, %arg1: memref<8x32xf32, #tpu.memory_space<vmem>>, %arg2: memref<8x32xf32, #tpu.memory_space<vmem>>) attributes {dimension_semantics = [#tpu.dimension_semantics<parallel>], iteration_bounds = array<i64: 2>, scalar_prefetch = 0 : i64, scratch_operands = 0 : i64, tpu.core_type = #tpu.core_type<tc>, window_params = [{transform_indices = @transform_0, window_bounds = array<i64: 8, 32>}, {transform_indices = @transform_1, window_bounds = array<i64: 8, 32>}]} {
    %c0 = arith.constant 0 : index
    %c0_0 = arith.constant 0 : index
    %0 = vector.load %arg1[%c0, %c0_0] : memref<8x32xf32, #tpu.memory_space<vmem>>, vector<8x32xf32>
    %1 = arith.mulf %0, %0 : vector<8x32xf32>
    %cst = arith.constant dense<0.000000e+00> : vector<8xf32>
    %2 = vector.multi_reduction <add>, %1, %cst [1] : vector<8x32xf32> to vector<8xf32>
    %3 = vector.shape_cast %2 : vector<8xf32> to vector<8x1xf32>
    %4 = math.sqrt %3 : vector<8x1xf32>
    %cst_1 = arith.constant 0.176776692 : f32
    %5 = vector.broadcast %cst_1 : f32 to vector<8x1xf32>
    %6 = arith.mulf %5, %4 : vector<8x1xf32>
    %cst_2 = arith.constant 9.99999997E-7 : f32
    %7 = vector.broadcast %cst_2 : f32 to vector<8x1xf32>
    %8 = arith.addf %6, %7 : vector<8x1xf32>
    %9 = vector.broadcast %8 : vector<8x1xf32> to vector<8x32xf32>
    %10 = arith.divf %0, %9 : vector<8x32xf32>
    %c0_3 = arith.constant 0 : index
    %c0_4 = arith.constant 0 : index
    %11 = vector.load %arg2[%c0_3, %c0_4] : memref<8x32xf32, #tpu.memory_space<vmem>>, vector<8x32xf32>
    tpu.vector_store %arg2[%c0_3, %c0_4], %10 {strides = array<i32>} : memref<8x32xf32, #tpu.memory_space<vmem>>, vector<8x32xf32>,
    return
  }
  func.func @transform_0(%arg0: i32) -> (i32, i32) {
    %c0_i32 = arith.constant 0 : i32
    %c0_i32_0 = arith.constant 0 : i32
    return %arg0, %c0_i32 : i32, i32
  }
  func.func @transform_1(%arg0: i32) -> (i32, i32) {
    %c0_i32 = arith.constant 0 : i32
    %c0_i32_0 = arith.constant 0 : i32
    return %arg0, %c0_i32 : i32, i32
  }
}

</mosaic_0001>

<bundles_post_ra>
// kernel: tpu_custom_call.1
= control target key start
LH: loop header
LB: loop body
LE: loop exit
PB: predicated region body
PF: predicated region fallthrough
CT: control target
= control target key end

     0   :  { %6 = vsyncpa [#allocation3], 0  ;;  %s559_s0 = inlined_call_operand.hbm [shape: f32[16,32], index: 0, kind: input, shape index: {}]   ;;  %s560_s1 = inlined_call_operand.hbm [shape: f32[16,32], index: 1, kind: output, shape index: {}]  }
   0x1   :  { %8 = vsyncpa [#allocation3 + $0x1], 0 }
   0x2   :  { %9 = vsyncpa [#allocation4], 0 }
   0x3   :  { %11 = vsyncpa [#allocation4 + $0x1], 0  ;;  %s426_s6 = smov 0   ;;  %s428_s7 = smov 0  }
   0x4   :  { %s430_s8 = smov 0   ;;  %s432_s9 = smov 0  }
   0x5 LB: > { %s447_s10 = sadd.s32 4294967295, %s414_s9   ;;  %s256_s11 = sadd.s32 4294967294, %s414_s9   ;;  %s414_s9 = sphi %s432_s9, %s570_s9   ;;  %s410_s8 = sphi %s430_s8, %s569_s8   ;;  %s406_s7 = sphi %s428_s7, %s568_s7   ;;  %s402_s6 = sphi %s426_s6, %s567_s6  }
   0x6   : > { %s451_s12 = sadd.s32 1, %s414_s9   ;;  %s24_s13 = sadd.s32 1, %s410_s8 }
   0x7   : > { %s21_s14 = ssub.s32 %s414_s9, %s451_s12  ;;  %p31_p0 = scmp.ne.s32.totalorder %s410_s8, %s406_s7 }
   0x8   : > { %p22_p1 = scmp.eq.s32.totalorder %s21_s14, 0  ;;  %p32_p2 = scmp.eq.s32.totalorder %s414_s9, 0 }
   0x9   : > { %p37_p3 = scmp.ne.s32.totalorder %s406_s7, %s402_s6  ;;  %p38_p4 = scmp.eq.s32.totalorder %s447_s10, 0 }
   0xa   : > { %s463_s15 = scalar_select %p22_p1, %s410_s8, %s24_s13  }
   0xb   : > { %p465_p5 = por %p32_p2, %p31_p0  ;;  %p469_p6 = por %p38_p4, %p37_p3 }
   0xc   : > { %p61_p7 = scmp.eq.s32.totalorder %s447_s10, 1  ;;  %p67_p8 = scmp.eq.s32.totalorder %s256_s11, 1 }
   0xd   : > { %p280_p10 = scmp.lt.s32.totalorder %s414_s9, 2  ;;  %s87_s20 = sand.u32 1, %s410_s8  }
   0xe   : > { %p476_p11 = por %p61_p7, %p31_p0  ;;  %p480_p12 = por %p67_p8, %p37_p3 }
   0xf   : > { %s260_s21 = sshll.u32 %s414_s9, 3  ;;  %s259_s22 = sshll.u32 %s87_s20, 3 }
  0x10   : > { %s95_s25 = scalar_lea.hbm %s559_s0, %s260_s21  ;;  %s91_s27 = scalar_lea.vmem [#allocation2], %s259_s22 }
  0x11   : > { %s97_s26 = sshll.u32 %s95_s25, 4  ;;  %s99_s28 = sshll.u32 %s91_s27, 4  ;;  %s98_s26 = int_to_ptr.hbm [resolvable:$true] %s97_s26  ;;  %s100_s28 = int_to_ptr.vmem [resolvable:$true] %s99_s28 }
  0x12   : > { %p491_p13 = pnand %p280_p10, %p465_p5  ;;  %p261_p0 = scmp.ge.s32.totalorder %s414_s9, 1 }
  0x13   : > { %p104_p1 = scmp.lt.s32.totalorder %s414_s9, 3  ;;  %s88_s30 = scalar_lea.sflag [#allocation3], %s87_s20 }
  0x14   : > { %s318_s2 = sshra.s32 %s98_s26, 4  ;;  %p322_p3 = pneg %p491_p13  ;;  %s319_s2 = int_to_ptr.hbm [resolvable:$true] %s318_s2 }
  0x15   : > { %s320_s3 = scalar_lea.hbm %s319_s2, 8  ;;  %s325_s11 = scalar_lea.hbm %s559_s0, 16 }
  0x16   : > { %p321_p2 = scmp.ne.s32.totalorder %s319_s2, %s320_s3  ;;  %p326_p5 = scmp.lt.s32.totalorder %s319_s2, %s559_s0 }
  0x17   : > { %p327_p8 = scmp.lt.s32.totalorder %s325_s11, %s320_s3 }
  0x18   : > { %p323_p4 = pnand %p322_p3, %p321_p2 }
  0x19   : > { %p328_p10 = por %p327_p8, %p326_p5 }
  0x1a   : > { %p324_p7 = pneg %p323_p4 }
  0x1c   : > { %p329_p9 = pnand %p328_p10, %p324_p7 }
  0x1e   : > { %332 = shalt.err (!%p329_p9)
}
  0x1f   : > { %275 = dma.hbm_to_vmem [thread:$0]  (!%p491_p13), %s98_s26, 128, %s100_s28, %s88_s30  }
  0x20   : > { %p105_p2 = pnand %p261_p0, %p104_p1 }
  0x21   : > { %s512_s16 = sand.u32 (!%p105_p2), 1, %s406_s7  }
  0x22   : > { %108 = sbr.rel (%p105_p2) target bundleno = 207 (0xcf), region = 24  ;;  %s262_s20 = sshll.u32 (!%p105_p2), %s512_s16, 3 }
  0x23   : > { %s111_s21 = scalar_lea.sflag (!%p105_p2), [#allocation3], %s512_s16  ;;  %s114_s22 = scalar_lea.vmem (!%p105_p2), [#allocation2], %s262_s20 }
  0x27   : > { %393 = dma.done.wait (%p469_p6), %s111_s21, 128  }
  0x28   : > { %395 = vsyncadd (%p469_p6), %s111_s21, 4294967168  ;;  %v134_v0 = vld [vmem:[%s114_s22] sm:$0xff]  ;;  %vm136_vm0 = vcmask 261120   ;;  %s265_s17 = sshll.u32 %s447_s10, 3  ;;  %s133_s26 = scalar_lea.vmem [#allocation5], %s262_s20 }
  0x29   : > { %v135_v1 = vmul.f32 %v134_v0, %v134_v0  ;;  %s181_s25 = scalar_lea.hbm %s560_s1, %s265_s17  ;;  %s183_s27 = sshll.u32 %s133_s26, 4  ;;  %s184_s27 = int_to_ptr.vmem [resolvable:$true] %s183_s27 }
  0x2a   : > { %s185_s28 = sshll.u32 %s181_s25, 4  ;;  %s171_s10 = scalar_lea.sflag [#allocation4], %s512_s16  ;;  %s186_s28 = int_to_ptr.hbm [resolvable:$true] %s185_s28 }
  0x2b   : > { %v137_v2 = vsel %vm136_vm0, %v135_v1, 0.0  ;;  %s362_s29 = sshra.s32 %s186_s28, 4  ;;  %s368_s4 = scalar_lea.hbm %s560_s1, 16  ;;  %s363_s29 = int_to_ptr.hbm [resolvable:$true] %s362_s29 }
  0x2c   : > { %138 = vadd.xlane.f32.xlu0 %v137_v2  ;;  %s364_s30 = scalar_lea.hbm %s363_s29, 8  ;;  %p369_p0 = scmp.lt.s32.totalorder %s363_s29, %s560_s1 }
  0x2d   : > { %p365_p6 = scmp.ne.s32.totalorder %s363_s29, %s364_s30  ;;  %p370_p1 = scmp.lt.s32.totalorder %s368_s4, %s364_s30 }
  0x2f   : > { %p366_p9 = pnand %p365_p6, %p476_p11  ;;  %p371_p3 = por %p370_p1, %p369_p0 }
  0x31   : > { %p367_p13 = pneg %p366_p9 }
  0x33   : > { %p372_p4 = pnand %p371_p3, %p367_p13 }
  0x9f   : > { %v139_v3 = vpop.xlane.xlu0 %138 }
  0xa0   : > { %314 = vrsqrt.f32 %v139_v3  ;;  %vm147_vm1 = vcmp.eq.f32.partialorder %v139_v3, inf  ;;  %v150_v11 = vand.u32 2147483648, %v139_v3  ;;  %vm149_vm2 = vcmp.eq.f32.partialorder %v139_v3, 0.0 }
  0xa6   : > { %v315_v4 = vpop.eup %314 }
  0xa7   : > { %v141_v5 = vmul.f32 %v315_v4, %v139_v3 }
  0xa9   : > { %v142_v6 = vmul.f32 %v315_v4, %v141_v5 }
  0xab   : > { %v143_v7 = vmul.f32 0.5, %v142_v6 }
  0xad   : > { %v144_v8 = vsub.f32 1.5, %v143_v7 }
  0xaf   : > { %v145_v9 = vmul.f32 %v315_v4, %v144_v8 }
  0xb1   : > { %v146_v10 = vmul.f32 %v145_v9, %v139_v3 }
  0xb3   : > { %v148_v12 = vsel %vm147_vm1, %v139_v3, %v146_v10 }
  0xb4   : > { %v151_v13 = vsel %vm149_vm2, %v150_v11, %v148_v12 }
  0xb5   : > { %v152_v14 = vmul.f32 0.17677669, %v151_v13 }
  0xb7   : > { %v153_v15 = vadd.f32 1e-06, %v152_v14 }
  0xb9   : > { %316 = vrcp.f32 %v153_v15  ;;  %v165_v19 = vand.u32 2147483648, %v153_v15  ;;  %v163_v21 = vand.u32 2147483647, %v153_v15  ;;  %vm159_vm4 = vweird.f32 %v153_v15 }
  0xbb   : > { %v166_v23 = vor.u32 1.1754944e-38, %v165_v19  ;;  %vm164_vm6 = vcmp.eq.f32.partialorder %v163_v21, 8.507059e+37 }
  0xbf   : > { %v317_v16 = vpop.eup %316 }
  0xc0   : > { %v155_v17 = vmul.f32 %v317_v16, %v153_v15  ;;  %vm160_vm3 = vweird.f32 %v317_v16 }
  0xc1   : > { %vm161_vm5 = vmor %vm159_vm4, %vm160_vm3 }
  0xc2   : > { %v156_v18 = vsub.f32 1.0, %v155_v17 }
  0xc4   : > { %v157_v20 = vmul.f32 %v317_v16, %v156_v18 }
  0xc6   : > { %v158_v22 = vadd.f32 %v317_v16, %v157_v20 }
  0xc8   : > { %v162_v24 = vsel %vm161_vm5, %v317_v16, %v158_v22 }
  0xc9   : > { %v167_v25 = vsel %vm164_vm6, %v166_v23, %v162_v24 }
  0xca   : > { %v168_v26 = vmul.f32 %v167_v25, %v134_v0 }
  0xcc   : > { %169 = vst.msk [vmem:[%s133_s26] sm:$0xff] %vm136_vm0, %v168_v26 }
  0xcd   : > { %375 = shalt.err (!%p372_p4)
}
  0xce   : > { %270 = dma.vmem_to_hbm [thread:$0]  (%p476_p11), %s184_s27, 128, %s186_s28, %s171_s10  }
  0xcf PF: > { %s197_s13 = sand.u32 1, %s402_s6   ;;  %p566_p7 = scmp.ge.s32.totalorder %s414_s9, 2 }
  0xd0   : > { %s198_s14 = scalar_lea.sflag [#allocation4], %s197_s13 }
  0xd1   : > { %p277_p5 = pnand %p566_p7, %p480_p12 }
  0xd3   : > { %p278_p8 = pneg %p277_p5 }
  0xd5   : > { %397 = dma.done.wait (%p278_p8), %s198_s14, 128  }
  0xd6   : > { %399 = vsyncadd (%p278_p8), %s198_s14, 4294967168  ;;  %p14_p10 = scmp.ge.s32.totalorder %s451_s12, 4   ;;  %s567_s6 = smov %s406_s7 }
  0xd7   : > { %s568_s7 = smov %s410_s8  ;;  %s569_s8 = smov %s463_s15 }
  0xd8   : > { %s570_s9 = smov %s451_s12  ;;  %16 = sbr.rel (!%p14_p10) target bundleno = 5 (0x5), region = 69 }
  0xdd   :  { %204 = vsyncpa [#allocation3], 1 }
  0xde   :  { %206 = vsyncpa [#allocation3 + $0x1], 1 }
  0xdf   :  { %207 = vsyncpa [#allocation4], 1 }
  0xe0   :  { %209 = vsyncpa [#allocation4 + $0x1], 1 }

</bundles_post_ra>
